<compile_context>
chip_gen: v5e
topology: v5e:2x2
jax: 0.10.0
libtpu: 0.0.40
codegen_flags: <defaults>
</compile_context>

<pallas_src>
import functools

import jax
import jax.numpy as jnp
from jax.experimental import pallas as pl
from jax.experimental.pallas import tpu as pltpu


FPAD = 128  # lane-dense feature slab width (all real feature dims are <= 16)


def _round_up(x, m):
    return ((x + m - 1) // m) * m


def _vmem_budget_bytes():
    """Generation-aware VMEM request: ~85% of physical capacity.

    v5e/v6e have 128 MiB VMEM -> ~108 MiB budget; v7x has 64 MiB -> ~54 MiB.
    Never request the full physical VMEM (compiler needs internal scratch)."""
    try:
        cap = int(pltpu.get_tpu_info().vmem_capacity_bytes)
    except Exception:  # pragma: no cover - conservative fallback
        cap = 128 << 20
    return max(32 << 20, int(cap * 0.85))


_VMEM_LIMIT = _vmem_budget_bytes()

# Largest graph for the fully fused (adj resident in VMEM) path: keep the bf16
# adjacency under ~half the budget, leaving room for activations / weights /
# compiler scratch.  Larger graphs go to the tiled streaming path.
FUSED_MAX_NODES = max(1024, (int((0.5 * _VMEM_LIMIT / 2) ** 0.5) // 128) * 128)


# ---------------------------------------------------------------------------
# Kernels
# ---------------------------------------------------------------------------
def _masked_softmax(z, valid_cols):
    """Softmax over the last dim, ignoring padded lanes >= valid_cols.

    Uses the approximate EUP reciprocal: rows sum to 1 within ~1e-3."""
    col = jax.lax.broadcasted_iota(jnp.int32, z.shape, dimension=1)
    z = jnp.where(col < valid_cols, z, -1e30)
    m = jnp.max(z, axis=-1, keepdims=True)
    e = jnp.exp(z - m)                      # padded lanes underflow to 0
    s = jnp.sum(e, axis=-1, keepdims=True)
    return e * pl.reciprocal(s, approx=True)


def fused_predictor_kernel(adj_ref, innorm_ref, outnorm_ref, x_ref,
                           cw_ref, cb_ref, rw_ref, rb_ref,
                           h_ref, r_ref, *, n_conv, n_reg, h_valid, r_valid):
    """Whole forward fused in VMEM (small-graph path, grid-less)."""
    adj = adj_ref[...]            # (Npad, Npad) bf16 raw 0/1 adjacency (dst,src)
    in_n = innorm_ref[...]        # (Npad, 1) f32  in_deg^-1/2  (per dst node)
    out_n = outnorm_ref[...]      # (Npad, 1) f32  out_deg^-1/2 (per src node)
    h = x_ref[...]                # (Npad, FPAD) f32

    # --- GraphConv stack: D_in^-1/2 A D_out^-1/2 (h W) + b, tanh / softmax ----
    for i in range(n_conv):
        xw = jnp.dot(h, cw_ref[i], preferred_element_type=jnp.float32)
        xw = (xw * out_n).astype(jnp.bfloat16)          # src-side norm, bf16 MXU feed
        agg = jnp.dot(adj, xw, preferred_element_type=jnp.float32)
        z = agg * in_n + cb_ref[i]                      # dst-side norm + bias
        if i < n_conv - 1:
            h = jnp.tanh(z)                             # padded lanes stay exactly 0
        else:
            h = _masked_softmax(z, h_valid)
    h_ref[...] = h

    # --- Regressor MLP: Linear + Tanh blocks, final Linear + Softmax ----------
    r = h
    for i in range(n_reg):
        z = jnp.dot(r, rw_ref[i], preferred_element_type=jnp.float32) + rb_ref[i]
        r = jnp.tanh(z) if i < n_reg - 1 else _masked_softmax(z, r_valid)
    r_ref[...] = r


def _conv_tile_kernel(adj_ref, xws_ref, innorm_ref, bias_ref, out_ref, acc_ref,
                      *, is_last, valid):
    """One GraphConv layer, tiled: grid=(rows 'parallel', K 'arbitrary')."""
    k = pl.program_id(1)

    @pl.when(k == 0)
    def _():
        acc_ref[...] = jnp.zeros_like(acc_ref)

    acc_ref[...] += jnp.dot(adj_ref[...], xws_ref[...],
                            preferred_element_type=jnp.float32)

    @pl.when(k == pl.num_programs(1) - 1)
    def _():
        z = acc_ref[...] * innorm_ref[...] + bias_ref[...]
        if is_last:
            out_ref[...] = _masked_softmax(z, valid)
        else:
            out_ref[...] = jnp.tanh(z)


def _regressor_tile_kernel(h_ref, rw_ref, rb_ref, r_ref, *, n_reg, r_valid):
    """Regressor MLP over a row tile (rows are independent)."""
    r = h_ref[...]
    for i in range(n_reg):
        z = jnp.dot(r, rw_ref[i], preferred_element_type=jnp.float32) + rb_ref[i]
        r = jnp.tanh(z) if i < n_reg - 1 else _masked_softmax(z, r_valid)
    r_ref[...] = r


# ---------------------------------------------------------------------------
# Host-side glue (all per-call work lives under a single jax.jit)
# ---------------------------------------------------------------------------
def _pad2d(x, rows, cols, dtype):
    out = jnp.zeros((rows, cols), dtype)
    return out.at[: x.shape[0], : x.shape[1]].set(x.astype(dtype))


def _degree_norms(adj):
    """DGL 'both' normalization vectors with degrees clamped to >= 1.

    adj[i, j] = 1 iff there is an edge j -> i (row = dst, col = src)."""
    in_deg = jnp.maximum(jnp.sum(adj, axis=1, dtype=jnp.float32), 1.0)
    out_deg = jnp.maximum(jnp.sum(adj, axis=0, dtype=jnp.float32), 1.0)
    return jax.lax.rsqrt(in_deg)[:, None], jax.lax.rsqrt(out_deg)[:, None]


def _forward_fused(adj, in_feat, cw, cb, rw, rb,
                   *, n_conv, n_reg, h_valid, r_valid):
    n = adj.shape[0]
    # Pad nodes to 16 sublanes for tiny graphs, to a 128-lane multiple once the
    # adjacency becomes the working set (lane-dense / MXU-aligned K dim).
    n_pad = _round_up(n, 16) if n <= 128 else _round_up(n, 128)

    in_norm, out_norm = _degree_norms(adj)
    adj_p = _pad2d(adj, n_pad, n_pad, jnp.bfloat16)    # raw 0/1 -> exact in bf16
    x_p = _pad2d(in_feat, n_pad, FPAD, jnp.float32)
    in_p = _pad2d(in_norm, n_pad, 1, jnp.float32)      # padded rows -> 0
    out_p = _pad2d(out_norm, n_pad, 1, jnp.float32)    # padded rows -> 0

    kernel = functools.partial(fused_predictor_kernel, n_conv=n_conv,
                               n_reg=n_reg, h_valid=h_valid, r_valid=r_valid)
    vmem = pl.BlockSpec(memory_space=pltpu.MemorySpace.VMEM)
    h_full, r_full = pl.pallas_call(
        kernel,
        out_shape=(jax.ShapeDtypeStruct((n_pad, FPAD), jnp.float32),
                   jax.ShapeDtypeStruct((n_pad, FPAD), jnp.float32)),
        in_specs=[vmem] * 8,
        out_specs=(vmem, vmem),
        compiler_params=pltpu.CompilerParams(vmem_limit_bytes=_VMEM_LIMIT),
    )(adj_p, in_p, out_p, x_p, cw, cb, rw, rb)

    return h_full[:n, :h_valid], r_full[:n, :r_valid]


def _conv_layer_tiled(adj_p, xws, in_p, bias, *, is_last, valid, tile):
    n_pad = adj_p.shape[0]
    kernel = functools.partial(_conv_tile_kernel, is_last=is_last, valid=valid)
    return pl.pallas_call(
        kernel,
        out_shape=jax.ShapeDtypeStruct((n_pad, FPAD), jnp.float32),
        grid_spec=pltpu.PrefetchScalarGridSpec(
            num_scalar_prefetch=0,
            grid=(n_pad // tile, n_pad // tile),
            in_specs=[pl.BlockSpec((tile, tile), lambda i, k: (i, k)),
                      pl.BlockSpec((tile, FPAD), lambda i, k: (k, 0)),
                      pl.BlockSpec((tile, 1), lambda i, k: (i, 0)),
                      pl.BlockSpec((1, FPAD), lambda i, k: (0, 0))],
            out_specs=pl.BlockSpec((tile, FPAD), lambda i, k: (i, 0)),
            scratch_shapes=[pltpu.VMEM((tile, FPAD), jnp.float32)]),
        compiler_params=pltpu.CompilerParams(
            dimension_semantics=("parallel", "arbitrary"),
            vmem_limit_bytes=_VMEM_LIMIT),
    )(adj_p, xws, in_p, bias)


def _regressor_tiled(h, rw, rb, *, n_reg, r_valid, tile):
    n_pad = h.shape[0]
    kernel = functools.partial(_regressor_tile_kernel, n_reg=n_reg, r_valid=r_valid)
    return pl.pallas_call(
        kernel,
        out_shape=jax.ShapeDtypeStruct((n_pad, FPAD), jnp.float32),
        grid_spec=pltpu.PrefetchScalarGridSpec(
            num_scalar_prefetch=0,
            grid=(n_pad // tile,),
            in_specs=[pl.BlockSpec((tile, FPAD), lambda i: (i, 0)),
                      pl.BlockSpec(rw.shape, lambda i: (0, 0, 0)),
                      pl.BlockSpec(rb.shape, lambda i: (0, 0, 0))],
            out_specs=pl.BlockSpec((tile, FPAD), lambda i: (i, 0))),
        compiler_params=pltpu.CompilerParams(
            dimension_semantics=("parallel",),
            vmem_limit_bytes=_VMEM_LIMIT),
    )(h, rw, rb)


def _forward_tiled(adj, in_feat, cw, cb, rw, rb,
                   *, n_conv, n_reg, h_valid, r_valid, tile):
    n = adj.shape[0]
    n_pad = _round_up(n, tile)

    in_norm, out_norm = _degree_norms(adj)
    adj_p = _pad2d(adj, n_pad, n_pad, jnp.bfloat16)
    x_p = _pad2d(in_feat, n_pad, FPAD, jnp.float32)
    in_p = _pad2d(in_norm, n_pad, 1, jnp.float32)
    out_p = _pad2d(out_norm, n_pad, 1, jnp.float32)

    h = x_p
    for i in range(n_conv):
        # The small (Npad,128)@(128,128) feature transform stays in XLA (fused
        # under the same jit); the N^2 adjacency aggregation streams through the
        # tiled Pallas kernel with bf16 MXU feeds and an f32 accumulator.
        xw = jnp.dot(h, cw[i], preferred_element_type=jnp.float32)
        xws = (xw * out_p).astype(jnp.bfloat16)
        h = _conv_layer_tiled(adj_p, xws, in_p, cb[i],
                              is_last=(i == n_conv - 1), valid=h_valid, tile=tile)
    r = _regressor_tiled(h, rw, rb, n_reg=n_reg, r_valid=r_valid, tile=tile)
    return h[:n, :h_valid], r[:n, :r_valid]


_forward_fused_jit = jax.jit(
    _forward_fused, static_argnames=("n_conv", "n_reg", "h_valid", "r_valid"))
_forward_tiled_jit = jax.jit(
    _forward_tiled, static_argnames=("n_conv", "n_reg", "h_valid", "r_valid", "tile"))


def _pick_tile(n):
    """Generation-aware tile: bigger on 128 MiB VMEM parts, smaller on v7x."""
    t_max = 512 if _VMEM_LIMIT >= (80 << 20) else 256
    n128 = _round_up(n, 128)
    for t in (t_max, 256, 128):
        if t <= n128 and n128 % t == 0:
            return t
    return 128


# ---------------------------------------------------------------------------
# Public API
# ---------------------------------------------------------------------------
def init_params(key, in_feats, predictor_layers, output_, regressor_layers):
    conv_dims = [in_feats] + list(predictor_layers) + [output_]
    reg_dims = [output_] + list(regressor_layers) + [in_feats]

    conv_params, reg_params = [], []
    for i in range(len(conv_dims) - 1):
        key, kw, kb = jax.random.split(key, 3)
        w = 0.3 * jax.random.normal(kw, (conv_dims[i], conv_dims[i + 1]), jnp.float32)
        b = 0.1 * jax.random.normal(kb, (1, conv_dims[i + 1]), jnp.float32)
        conv_params.append((w, b))
    for i in range(len(reg_dims) - 1):
        key, kw, kb = jax.random.split(key, 3)
        w = 0.3 * jax.random.normal(kw, (reg_dims[i], reg_dims[i + 1]), jnp.float32)
        b = 0.1 * jax.random.normal(kb, (1, reg_dims[i + 1]), jnp.float32)
        reg_params.append((w, b))
    return conv_params, reg_params


def _pack(params, fpad=FPAD):
    ws, bs = [], []
    for w, b in params:
        assert w.shape[0] <= fpad and w.shape[1] <= fpad
        ws.append(jnp.pad(w.astype(jnp.float32),
                          ((0, fpad - w.shape[0]), (0, fpad - w.shape[1]))))
        bs.append(jnp.pad(b.astype(jnp.float32).reshape(1, -1),
                          ((0, 0), (0, fpad - b.shape[-1]))))
    return jnp.stack(ws), jnp.stack(bs)


def pack_params(conv_params, reg_params):
    """ONE-TIME packing into zero-padded stacked slabs (not per forward)."""
    cw, cb = _pack(conv_params)
    rw, rb = _pack(reg_params)
    meta = dict(n_conv=len(conv_params), n_reg=len(reg_params),
                h_valid=conv_params[-1][0].shape[1],
                r_valid=reg_params[-1][0].shape[1])
    return (cw, cb, rw, rb), meta


def predictor_forward(adj, in_feat, slabs, meta, *, force_tiled=False, tile=None):
    """Forward pass.  adj is the RAW 0/1 dense adjacency (row=dst, col=src)."""
    cw, cb, rw, rb = slabs
    n = adj.shape[0]
    if force_tiled or n > FUSED_MAX_NODES:
        t = tile if tile is not None else _pick_tile(n)
        return _forward_tiled_jit(adj, in_feat, cw, cb, rw, rb, tile=t, **meta)
    return _forward_fused_jit(adj, in_feat, cw, cb, rw, rb, **meta)


def reference_forward(adj_f32, in_feat, conv_params, reg_params):
    """Pure-jnp f32 reference (same math, exact softmax)."""
    in_n, out_n = _degree_norms(adj_f32)
    h = in_feat
    nc = len(conv_params)
    for i, (w, b) in enumerate(conv_params):
        z = in_n * (adj_f32 @ ((h @ w) * out_n)) + b
        h = jnp.tanh(z) if i < nc - 1 else jax.nn.softmax(z, axis=1)
    r = h
    nr = len(reg_params)
    for i, (w, b) in enumerate(reg_params):
        z = r @ w + b
        r = jnp.tanh(z) if i < nr - 1 else jax.nn.softmax(z, axis=1)
    return h, r


if __name__ == "__main__":
    key = jax.random.PRNGKey(0)

    # Small shapes consistent with the module's constructor.
    N = 8                      # number of graph nodes
    frame_len = 4              # len(frame) == input feature dim == regressor out dim
    predictor_layers = [16, 8]
    output_ = 8
    regressor_layers = [16, 8]

    key, k_adj, k_x, k_p, k_adj2, k_x2 = jax.random.split(key, 6)

    # Deterministic random directed graph (row = dst, col = src); raw 0/1 values
    # are exactly representable in bf16.
    adj = (jax.random.uniform(k_adj, (N, N)) < 0.4).astype(jnp.bfloat16)
    in_feat = jax.random.normal(k_x, (N, frame_len), jnp.float32)

    conv_params, reg_params = init_params(
        k_p, frame_len, predictor_layers, output_, regressor_layers)
    slabs, meta = pack_params(conv_params, reg_params)   # packed once

    # ---- fused small-graph path -------------------------------------------
    h, r = predictor_forward(adj, in_feat, slabs, meta)
    jax.block_until_ready((h, r))
    assert h.shape == (N, output_) and r.shape == (N, frame_len)

    h_ref, r_ref = reference_forward(adj.astype(jnp.float32), in_feat,
                                     conv_params, reg_params)
    # Documented tolerance: bf16 MXU feeds + approximate EUP reciprocal softmax
    # vs. an exact f32 reference (original module uses torch.double).
    assert bool(jnp.allclose(h, h_ref, atol=5e-2)), "fused h mismatch"
    assert bool(jnp.allclose(r, r_ref, atol=5e-2)), "fused r mismatch"

    # ---- tiled large-graph path (forced, modest size to keep the demo fast) --
    N2 = 256
    adj2 = (jax.random.uniform(k_adj2, (N2, N2)) < 0.05).astype(jnp.bfloat16)
    in_feat2 = jax.random.normal(k_x2, (N2, frame_len), jnp.float32)
    h2, r2 = predictor_forward(adj2, in_feat2, slabs, meta,
                               force_tiled=True, tile=128)
    jax.block_until_ready((h2, r2))
    assert h2.shape == (N2, output_) and r2.shape == (N2, frame_len)

    h2_ref, r2_ref = reference_forward(adj2.astype(jnp.float32), in_feat2,
                                       conv_params, reg_params)
    assert bool(jnp.allclose(h2, h2_ref, atol=5e-2)), "tiled h mismatch"
    assert bool(jnp.allclose(r2, r2_ref, atol=5e-2)), "tiled r mismatch"

    print("KERNEL_OK")
</pallas_src>

<mosaic_0001>
module attributes {stable_mosaic.version = 11 : i64} {
  func.func @fused_predictor_kernel(%arg0: memref<16x16xbf16, #tpu.memory_space<vmem>>, %arg1: memref<16x1xf32, #tpu.memory_space<vmem>>, %arg2: memref<16x1xf32, #tpu.memory_space<vmem>>, %arg3: memref<16x128xf32, #tpu.memory_space<vmem>>, %arg4: memref<3x128x128xf32, #tpu.memory_space<vmem>>, %arg5: memref<3x1x128xf32, #tpu.memory_space<vmem>>, %arg6: memref<3x128x128xf32, #tpu.memory_space<vmem>>, %arg7: memref<3x1x128xf32, #tpu.memory_space<vmem>>, %arg8: memref<16x128xf32, #tpu.memory_space<vmem>>, %arg9: memref<16x128xf32, #tpu.memory_space<vmem>>) attributes {dimension_semantics = [], scalar_prefetch = 0 : i64, scratch_operands = 0 : i64, tpu.core_type = #tpu.core_type<tc>} {
    %c0 = arith.constant 0 : index
    %c0_0 = arith.constant 0 : index
    %0 = vector.load %arg0[%c0, %c0_0] : memref<16x16xbf16, #tpu.memory_space<vmem>>, vector<16x16xbf16>
    %c0_1 = arith.constant 0 : index
    %c0_2 = arith.constant 0 : index
    %1 = vector.load %arg1[%c0_1, %c0_2] : memref<16x1xf32, #tpu.memory_space<vmem>>, vector<16x1xf32>
    %c0_3 = arith.constant 0 : index
    %c0_4 = arith.constant 0 : index
    %2 = vector.load %arg2[%c0_3, %c0_4] : memref<16x1xf32, #tpu.memory_space<vmem>>, vector<16x1xf32>
    %c0_5 = arith.constant 0 : index
    %c0_6 = arith.constant 0 : index
    %3 = vector.load %arg3[%c0_5, %c0_6] : memref<16x128xf32, #tpu.memory_space<vmem>>, vector<16x128xf32>
    %c0_7 = arith.constant 0 : index
    %c0_8 = arith.constant 0 : index
    %c0_9 = arith.constant 0 : index
    %4 = vector.load %arg4[%c0_7, %c0_8, %c0_9] : memref<3x128x128xf32, #tpu.memory_space<vmem>>, vector<1x128x128xf32>
    %5 = vector.shape_cast %4 : vector<1x128x128xf32> to vector<128x128xf32>
    %cst = arith.constant dense<0.000000e+00> : vector<16x128xf32>
    %6 = tpu.matmul %3, %5, %cst {dimension_numbers = #tpu.dot_dimension_numbers<[1], [0], [0], [1], [0, 0, 1, 1], [], []>} : vector<16x128xf32>, vector<128x128xf32>, vector<16x128xf32> -> vector<16x128xf32>
    %7 = vector.broadcast %2 : vector<16x1xf32> to vector<16x128xf32>
    %8 = arith.mulf %6, %7 : vector<16x128xf32>
    %9 = arith.truncf %8 : vector<16x128xf32> to vector<16x128xbf16>
    %cst_10 = arith.constant dense<0.000000e+00> : vector<16x128xf32>
    %10 = tpu.matmul %0, %9, %cst_10 {dimension_numbers = #tpu.dot_dimension_numbers<[1], [0], [0], [1], [0, 0, 1, 1], [], []>} : vector<16x16xbf16>, vector<16x128xbf16>, vector<16x128xf32> -> vector<16x128xf32>
    %11 = vector.broadcast %1 : vector<16x1xf32> to vector<16x128xf32>
    %12 = arith.mulf %10, %11 : vector<16x128xf32>
    %c0_11 = arith.constant 0 : index
    %c0_12 = arith.constant 0 : index
    %c0_13 = arith.constant 0 : index
    %13 = vector.load %arg5[%c0_11, %c0_12, %c0_13] : memref<3x1x128xf32, #tpu.memory_space<vmem>>, vector<1x1x128xf32>
    %14 = vector.shape_cast %13 : vector<1x1x128xf32> to vector<1x128xf32>
    %15 = vector.broadcast %14 : vector<1x128xf32> to vector<16x128xf32>
    %16 = arith.addf %12, %15 : vector<16x128xf32>
    %17 = math.tanh %16 : vector<16x128xf32>
    %c1 = arith.constant 1 : index
    %c0_14 = arith.constant 0 : index
    %c0_15 = arith.constant 0 : index
    %18 = vector.load %arg4[%c1, %c0_14, %c0_15] : memref<3x128x128xf32, #tpu.memory_space<vmem>>, vector<1x128x128xf32>
    %19 = vector.shape_cast %18 : vector<1x128x128xf32> to vector<128x128xf32>
    %cst_16 = arith.constant dense<0.000000e+00> : vector<16x128xf32>
    %20 = tpu.matmul %17, %19, %cst_16 {dimension_numbers = #tpu.dot_dimension_numbers<[1], [0], [0], [1], [0, 0, 1, 1], [], []>} : vector<16x128xf32>, vector<128x128xf32>, vector<16x128xf32> -> vector<16x128xf32>
    %21 = vector.broadcast %2 : vector<16x1xf32> to vector<16x128xf32>
    %22 = arith.mulf %20, %21 : vector<16x128xf32>
    %23 = arith.truncf %22 : vector<16x128xf32> to vector<16x128xbf16>
    %cst_17 = arith.constant dense<0.000000e+00> : vector<16x128xf32>
    %24 = tpu.matmul %0, %23, %cst_17 {dimension_numbers = #tpu.dot_dimension_numbers<[1], [0], [0], [1], [0, 0, 1, 1], [], []>} : vector<16x16xbf16>, vector<16x128xbf16>, vector<16x128xf32> -> vector<16x128xf32>
    %25 = vector.broadcast %1 : vector<16x1xf32> to vector<16x128xf32>
    %26 = arith.mulf %24, %25 : vector<16x128xf32>
    %c1_18 = arith.constant 1 : index
    %c0_19 = arith.constant 0 : index
    %c0_20 = arith.constant 0 : index
    %27 = vector.load %arg5[%c1_18, %c0_19, %c0_20] : memref<3x1x128xf32, #tpu.memory_space<vmem>>, vector<1x1x128xf32>
    %28 = vector.shape_cast %27 : vector<1x1x128xf32> to vector<1x128xf32>
    %29 = vector.broadcast %28 : vector<1x128xf32> to vector<16x128xf32>
    %30 = arith.addf %26, %29 : vector<16x128xf32>
    %31 = math.tanh %30 : vector<16x128xf32>
    %c2 = arith.constant 2 : index
    %c0_21 = arith.constant 0 : index
    %c0_22 = arith.constant 0 : index
    %32 = vector.load %arg4[%c2, %c0_21, %c0_22] : memref<3x128x128xf32, #tpu.memory_space<vmem>>, vector<1x128x128xf32>
    %33 = vector.shape_cast %32 : vector<1x128x128xf32> to vector<128x128xf32>
    %cst_23 = arith.constant dense<0.000000e+00> : vector<16x128xf32>
    %34 = tpu.matmul %31, %33, %cst_23 {dimension_numbers = #tpu.dot_dimension_numbers<[1], [0], [0], [1], [0, 0, 1, 1], [], []>} : vector<16x128xf32>, vector<128x128xf32>, vector<16x128xf32> -> vector<16x128xf32>
    %35 = vector.broadcast %2 : vector<16x1xf32> to vector<16x128xf32>
    %36 = arith.mulf %34, %35 : vector<16x128xf32>
    %37 = arith.truncf %36 : vector<16x128xf32> to vector<16x128xbf16>
    %cst_24 = arith.constant dense<0.000000e+00> : vector<16x128xf32>
    %38 = tpu.matmul %0, %37, %cst_24 {dimension_numbers = #tpu.dot_dimension_numbers<[1], [0], [0], [1], [0, 0, 1, 1], [], []>} : vector<16x16xbf16>, vector<16x128xbf16>, vector<16x128xf32> -> vector<16x128xf32>
    %39 = vector.broadcast %1 : vector<16x1xf32> to vector<16x128xf32>
    %40 = arith.mulf %38, %39 : vector<16x128xf32>
    %c2_25 = arith.constant 2 : index
    %c0_26 = arith.constant 0 : index
    %c0_27 = arith.constant 0 : index
    %41 = vector.load %arg5[%c2_25, %c0_26, %c0_27] : memref<3x1x128xf32, #tpu.memory_space<vmem>>, vector<1x1x128xf32>
    %42 = vector.shape_cast %41 : vector<1x1x128xf32> to vector<1x128xf32>
    %43 = vector.broadcast %42 : vector<1x128xf32> to vector<16x128xf32>
    %44 = arith.addf %40, %43 : vector<16x128xf32>
    %45 = tpu.iota {dimensions = array<i32: 1>} : vector<16x128xi32>
    %c8_i32 = arith.constant 8 : i32
    %46 = vector.broadcast %c8_i32 : i32 to vector<16x128xi32>
    %47 = arith.cmpi slt, %45, %46 : vector<16x128xi32>
    %cst_28 = arith.constant -1.000000e+30 : f32
    %48 = vector.broadcast %cst_28 : f32 to vector<16x128xf32>
    %49 = arith.select %47, %44, %48 : vector<16x128xi1>, vector<16x128xf32>
    %cst_29 = arith.constant dense<0xFF800000> : vector<16xf32>
    %50 = vector.multi_reduction <maximumf>, %49, %cst_29 [1] : vector<16x128xf32> to vector<16xf32>
    %51 = vector.shape_cast %50 : vector<16xf32> to vector<16x1xf32>
    %52 = vector.broadcast %51 : vector<16x1xf32> to vector<16x128xf32>
    %53 = arith.subf %49, %52 : vector<16x128xf32>
    %54 = math.exp %53 : vector<16x128xf32>
    %cst_30 = arith.constant dense<0.000000e+00> : vector<16xf32>
    %55 = vector.multi_reduction <add>, %54, %cst_30 [1] : vector<16x128xf32> to vector<16xf32>
    %56 = vector.shape_cast %55 : vector<16xf32> to vector<16x1xf32>
    %57 = tpu.reciprocal %56 {approx = true} : vector<16x1xf32> -> vector<16x1xf32>
    %58 = vector.broadcast %57 : vector<16x1xf32> to vector<16x128xf32>
    %59 = arith.mulf %54, %58 : vector<16x128xf32>
    %c0_31 = arith.constant 0 : index
    %c0_32 = arith.constant 0 : index
    %60 = vector.load %arg8[%c0_31, %c0_32] : memref<16x128xf32, #tpu.memory_space<vmem>>, vector<16x128xf32>
    tpu.vector_store %arg8[%c0_31, %c0_32], %59 {strides = array<i32>} : memref<16x128xf32, #tpu.memory_space<vmem>>, vector<16x128xf32>,
    %c0_33 = arith.constant 0 : index
    %c0_34 = arith.constant 0 : index
    %c0_35 = arith.constant 0 : index
    %61 = vector.load %arg6[%c0_33, %c0_34, %c0_35] : memref<3x128x128xf32, #tpu.memory_space<vmem>>, vector<1x128x128xf32>
    %62 = vector.shape_cast %61 : vector<1x128x128xf32> to vector<128x128xf32>
    %cst_36 = arith.constant dense<0.000000e+00> : vector<16x128xf32>
    %63 = tpu.matmul %59, %62, %cst_36 {dimension_numbers = #tpu.dot_dimension_numbers<[1], [0], [0], [1], [0, 0, 1, 1], [], []>} : vector<16x128xf32>, vector<128x128xf32>, vector<16x128xf32> -> vector<16x128xf32>
    %c0_37 = arith.constant 0 : index
    %c0_38 = arith.constant 0 : index
    %c0_39 = arith.constant 0 : index
    %64 = vector.load %arg7[%c0_37, %c0_38, %c0_39] : memref<3x1x128xf32, #tpu.memory_space<vmem>>, vector<1x1x128xf32>
    %65 = vector.shape_cast %64 : vector<1x1x128xf32> to vector<1x128xf32>
    %66 = vector.broadcast %65 : vector<1x128xf32> to vector<16x128xf32>
    %67 = arith.addf %63, %66 : vector<16x128xf32>
    %68 = math.tanh %67 : vector<16x128xf32>
    %c1_40 = arith.constant 1 : index
    %c0_41 = arith.constant 0 : index
    %c0_42 = arith.constant 0 : index
    %69 = vector.load %arg6[%c1_40, %c0_41, %c0_42] : memref<3x128x128xf32, #tpu.memory_space<vmem>>, vector<1x128x128xf32>
    %70 = vector.shape_cast %69 : vector<1x128x128xf32> to vector<128x128xf32>
    %cst_43 = arith.constant dense<0.000000e+00> : vector<16x128xf32>
    %71 = tpu.matmul %68, %70, %cst_43 {dimension_numbers = #tpu.dot_dimension_numbers<[1], [0], [0], [1], [0, 0, 1, 1], [], []>} : vector<16x128xf32>, vector<128x128xf32>, vector<16x128xf32> -> vector<16x128xf32>
    %c1_44 = arith.constant 1 : index
    %c0_45 = arith.constant 0 : index
    %c0_46 = arith.constant 0 : index
    %72 = vector.load %arg7[%c1_44, %c0_45, %c0_46] : memref<3x1x128xf32, #tpu.memory_space<vmem>>, vector<1x1x128xf32>
    %73 = vector.shape_cast %72 : vector<1x1x128xf32> to vector<1x128xf32>
    %74 = vector.broadcast %73 : vector<1x128xf32> to vector<16x128xf32>
    %75 = arith.addf %71, %74 : vector<16x128xf32>
    %76 = math.tanh %75 : vector<16x128xf32>
    %c2_47 = arith.constant 2 : index
    %c0_48 = arith.constant 0 : index
    %c0_49 = arith.constant 0 : index
    %77 = vector.load %arg6[%c2_47, %c0_48, %c0_49] : memref<3x128x128xf32, #tpu.memory_space<vmem>>, vector<1x128x128xf32>
    %78 = vector.shape_cast %77 : vector<1x128x128xf32> to vector<128x128xf32>
    %cst_50 = arith.constant dense<0.000000e+00> : vector<16x128xf32>
    %79 = tpu.matmul %76, %78, %cst_50 {dimension_numbers = #tpu.dot_dimension_numbers<[1], [0], [0], [1], [0, 0, 1, 1], [], []>} : vector<16x128xf32>, vector<128x128xf32>, vector<16x128xf32> -> vector<16x128xf32>
    %c2_51 = arith.constant 2 : index
    %c0_52 = arith.constant 0 : index
    %c0_53 = arith.constant 0 : index
    %80 = vector.load %arg7[%c2_51, %c0_52, %c0_53] : memref<3x1x128xf32, #tpu.memory_space<vmem>>, vector<1x1x128xf32>
    %81 = vector.shape_cast %80 : vector<1x1x128xf32> to vector<1x128xf32>
    %82 = vector.broadcast %81 : vector<1x128xf32> to vector<16x128xf32>
    %83 = arith.addf %79, %82 : vector<16x128xf32>
    %84 = tpu.iota {dimensions = array<i32: 1>} : vector<16x128xi32>
    %c4_i32 = arith.constant 4 : i32
    %85 = vector.broadcast %c4_i32 : i32 to vector<16x128xi32>
    %86 = arith.cmpi slt, %84, %85 : vector<16x128xi32>
    %cst_54 = arith.constant -1.000000e+30 : f32
    %87 = vector.broadcast %cst_54 : f32 to vector<16x128xf32>
    %88 = arith.select %86, %83, %87 : vector<16x128xi1>, vector<16x128xf32>
    %cst_55 = arith.constant dense<0xFF800000> : vector<16xf32>
    %89 = vector.multi_reduction <maximumf>, %88, %cst_55 [1] : vector<16x128xf32> to vector<16xf32>
    %90 = vector.shape_cast %89 : vector<16xf32> to vector<16x1xf32>
    %91 = vector.broadcast %90 : vector<16x1xf32> to vector<16x128xf32>
    %92 = arith.subf %88, %91 : vector<16x128xf32>
    %93 = math.exp %92 : vector<16x128xf32>
    %cst_56 = arith.constant dense<0.000000e+00> : vector<16xf32>
    %94 = vector.multi_reduction <add>, %93, %cst_56 [1] : vector<16x128xf32> to vector<16xf32>
    %95 = vector.shape_cast %94 : vector<16xf32> to vector<16x1xf32>
    %96 = tpu.reciprocal %95 {approx = true} : vector<16x1xf32> -> vector<16x1xf32>
    %97 = vector.broadcast %96 : vector<16x1xf32> to vector<16x128xf32>
    %98 = arith.mulf %93, %97 : vector<16x128xf32>
    %c0_57 = arith.constant 0 : index
    %c0_58 = arith.constant 0 : index
    %99 = vector.load %arg9[%c0_57, %c0_58] : memref<16x128xf32, #tpu.memory_space<vmem>>, vector<16x128xf32>
    tpu.vector_store %arg9[%c0_57, %c0_58], %98 {strides = array<i32>} : memref<16x128xf32, #tpu.memory_space<vmem>>, vector<16x128xf32>,
    return
  }
}

</mosaic_0001>

<bundles_post_ra>
// kernel: _forward_fused.1
= control target key start
LH: loop header
LB: loop body
LE: loop exit
PB: predicated region body
PF: predicated region fallthrough
CT: control target
= control target key end

     0   :  { %15 = vsyncpa [#allocation3], 0  ;;  %s765_s0 = inlined_call_operand.vmem [shape: bf16[16,16], index: 0, kind: input, shape index: {}]   ;;  %s766_s1 = inlined_call_operand.vmem [shape: f32[16,1], index: 1, kind: input, shape index: {}]   ;;  %s767_s2 = inlined_call_operand.vmem [shape: f32[16,1], index: 2, kind: input, shape index: {}]   ;;  %s768_s3 = inlined_call_operand.vmem [shape: f32[16,128], index: 3, kind: input, shape index: {}]   ;;  %s769_s4 = inlined_call_operand.hbm [shape: f32[3,128,128], index: 4, kind: input, shape index: {}]   ;;  %s770_s5 = inlined_call_operand.vmem [shape: f32[3,1,128], index: 5, kind: input, shape index: {}]   ;;  %s771_s6 = inlined_call_operand.hbm [shape: f32[3,128,128], index: 6, kind: input, shape index: {}]   ;;  %s772_s7 = inlined_call_operand.vmem [shape: f32[3,1,128], index: 7, kind: input, shape index: {}]   ;;  %s773_s8 = inlined_call_operand.vmem [shape: f32[16,128], index: 8, kind: output, shape index: {0}]   ;;  %s774_s9 = inlined_call_operand.vmem [shape: f32[16,128], index: 9, kind: output, shape index: {1}]  }
   0x1   :  { %s29_s11 = sshll.u32 %s769_s4, 4  ;;  %s30_s11 = int_to_ptr.hbm [resolvable:$true] %s29_s11 }
   0x2   :  { %16 = vsyncpa [#allocation5], 0  ;;  %s621_s12 = smov [#allocation2]   ;;  %s44_s16 = sshll.u32 %s771_s6, 4  ;;  %s45_s16 = int_to_ptr.hbm [resolvable:$true] %s44_s16 }
   0x3   :  { %s31_s13 = sshll.u32 %s621_s12, 4  ;;  %s622_s17 = smov 128   ;;  %s32_s13 = int_to_ptr.vmem [resolvable:$true] %s31_s13 }
   0x4   :  { %s623_s18 = smov 8   ;;  %s624_s19 = smov [#allocation4]  }
   0x5   :  { %37 = dma.hbm_to_vmem [thread:$0]  %s30_s11, 6144, %s32_s13, [#allocation3], %s622_s17, %s622_s17, %s623_s18  }
   0x6   :  { %s46_s20 = sshll.u32 %s624_s19, 4  ;;  %s47_s20 = int_to_ptr.vmem [resolvable:$true] %s46_s20 }
   0x7   :  { %52 = dma.hbm_to_vmem [thread:$0]  %s45_s16, 6144, %s47_s20, [#allocation5], %s622_s17, %s622_s17, %s623_s18  }
   0x8   :  { %617 = dma.done.wait [#allocation3], 6144  }
   0x9   :  { %618 = vsyncadd [#allocation3], 4294961152 }
   0xa   :  { %619 = dma.done.wait [#allocation5], 6144  }
   0xb   :  { %620 = vsyncadd [#allocation5], 4294961152  ;;  %v87_v0 = vld [vmem:[#allocation2 + $0x78] sm:$0xff]  ;;  %v86_v1 = vld [vmem:[#allocation2 + $0x70] sm:$0xff]  ;;  %v625_v2 = vmov 0   ;;  %vm129_vm0 = vcmask 130048  }
   0xc   :  { %88 = vmatpush.msra.mxu0 %v87_v0  ;;  %529 = vset.pattern.permute.xlu0 %v625_v2  ;;  %v85_v3 = vld [vmem:[#allocation2 + $0x68] sm:$0xff]  ;;  %v84_v4 = vld [vmem:[#allocation2 + $0x60] sm:$0xff]  ;;  %v83_v6 = vld [vmem:[#allocation2 + $0x58] sm:$0xff] }
   0xd   :  { %530 = vset.pattern.permute.xlu1 %v625_v2  ;;  %v68_v5 = vld [vmem:[%s767_s2] sm:$0xff]  ;;  %v82_v7 = vld [vmem:[#allocation2 + $0x50] sm:$0xff]  ;;  %v81_v8 = vld [vmem:[#allocation2 + $0x48] sm:$0xff] }
   0xe   :  { %89 = vmatpush.msra.mxu0 %v86_v1  ;;  %113 = vperm.xlu0 %529, %v68_v5   ;;  %v69_v9 = vld [vmem:[%s767_s2 + $0x8] sm:$0xff]  ;;  %v80_v10 = vld [vmem:[#allocation2 + $0x40] sm:$0xff]  ;;  %v79_v11 = vld [vmem:[#allocation2 + $0x38] sm:$0xff] }
   0xf   :  { %v78_v12 = vld [vmem:[#allocation2 + $0x30] sm:$0xff]  ;;  %v77_v13 = vld [vmem:[#allocation2 + $0x28] sm:$0xff]  ;;  %v76_v14 = vld [vmem:[#allocation2 + $0x20] sm:$0xff] }
  0x10   :  { %90 = vmatpush.msra.mxu0 %v85_v3  ;;  %v75_v15 = vld [vmem:[#allocation2 + $0x18] sm:$0xff]  ;;  %v74_v16 = vld [vmem:[#allocation2 + $0x10] sm:$0xff]  ;;  %v73_v17 = vld [vmem:[#allocation2 + $0x8] sm:$0xff] }
  0x11   :  { %v72_v18 = vld [vmem:[#allocation2] sm:$0xff]  ;;  %v71_v20 = vld [vmem:[%s768_s3 + $0x8] sm:$0xff]  ;;  %v183_v22 = vld [vmem:[#allocation2 + $0xf8] sm:$0xff] }
  0x12   :  { %91 = vmatpush.msra.mxu0 %v84_v4  ;;  %v70_v19 = vld [vmem:[%s768_s3] sm:$0xff]  ;;  %184 = vmatpush.msra.mxu2 %v183_v22  ;;  %v182_v23 = vld [vmem:[#allocation2 + $0xf0] sm:$0xff]  ;;  %v181_v24 = vld [vmem:[#allocation2 + $0xe8] sm:$0xff] }
  0x13   :  { %v66_v21 = vld [vmem:[%s766_s1] sm:$0xff]  ;;  %v67_v26 = vld [vmem:[%s766_s1 + $0x8] sm:$0xff]  ;;  %v179_v27 = vld [vmem:[#allocation2 + $0xd8] sm:$0xff] }
  0x14   :  { %92 = vmatpush.msra.mxu0 %v83_v6  ;;  %149 = vperm.xlu1 %530, %v66_v21   ;;  %v180_v25 = vld [vmem:[#allocation2 + $0xe0] sm:$0xff]  ;;  %v178_v28 = vld [vmem:[#allocation2 + $0xd0] sm:$0xff]  ;;  %v177_v37 = vld [vmem:[#allocation2 + $0xc8] sm:$0xff] }
  0x15   :  { %185 = vmatpush.msra.mxu2 %v182_v23  ;;  %v709_v36 = vld [vmem:[%s765_s0] sm:$0xff]  ;;  %v175_v39 = vld [vmem:[#allocation2 + $0xb8] sm:$0xff]  ;;  %v174_v40 = vld [vmem:[#allocation2 + $0xb0] sm:$0xff] }
  0x16   :  { %93 = vmatpush.msra.mxu0 %v82_v7  ;;  %118 = vperm.xlu0 %529, %v69_v9   ;;  %v176_v38 = vld [vmem:[#allocation2 + $0xc0] sm:$0xff]  ;;  %v173_v41 = vld [vmem:[#allocation2 + $0xa8] sm:$0xff]  ;;  %v171_v43 = vld [vmem:[#allocation2 + $0x98] sm:$0xff] }
  0x17   :  { %186 = vmatpush.msra.mxu2 %v181_v24  ;;  %v172_v42 = vld [vmem:[#allocation2 + $0xa0] sm:$0xff]  ;;  %v170_v44 = vld [vmem:[#allocation2 + $0x90] sm:$0xff]  ;;  %v169_v45 = vld [vmem:[#allocation2 + $0x88] sm:$0xff] }
  0x18   :  { %94 = vmatpush.msra.mxu0 %v81_v8  ;;  %v168_v46 = vld [vmem:[#allocation2 + $0x80] sm:$0xff]  ;;  %v251_v58 = vld [vmem:[#allocation2 + $0x178] sm:$0xff]  ;;  %v250_v59 = vld [vmem:[#allocation2 + $0x170] sm:$0xff] }
  0x19   :  { %187 = vmatpush.msra.mxu2 %v180_v25  ;;  %v531_v48 = vld [vmem:[%s770_s5] ss:$0 sm:$0xff]  ;;  %v249_v60 = vld [vmem:[#allocation2 + $0x168] sm:$0xff]  ;;  %v247_v62 = vld [vmem:[#allocation2 + $0x158] sm:$0xff] }
  0x1a   :  { %95 = vmatpush.msra.mxu0 %v80_v10  ;;  %v248_v61 = vld [vmem:[#allocation2 + $0x160] sm:$0xff]  ;;  %v246_v63 = vld [vmem:[#allocation2 + $0x150] sm:$0xff]  ;;  %v245_v0 = vld [vmem:[#allocation2 + $0x148] sm:$0xff] }
  0x1b   :  { %188 = vmatpush.msra.mxu2 %v179_v27  ;;  %v244_v1 = vld [vmem:[#allocation2 + $0x140] sm:$0xff]  ;;  %v243_v2 = vld [vmem:[#allocation2 + $0x138] sm:$0xff]  ;;  %v242_v4 = vld [vmem:[#allocation2 + $0x130] sm:$0xff] }
  0x1c   :  { %96 = vmatpush.msra.mxu0 %v79_v11  ;;  %154 = vperm.xlu1 %530, %v67_v26   ;;  %v241_v9 = vld [vmem:[#allocation2 + $0x128] sm:$0xff]  ;;  %v240_v10 = vld [vmem:[#allocation2 + $0x120] sm:$0xff]  ;;  %v239_v11 = vld [vmem:[#allocation2 + $0x118] sm:$0xff] }
  0x1d   :  { %189 = vmatpush.msra.mxu2 %v178_v28 }
  0x1e   :  { %97 = vmatpush.msra.mxu0 %v78_v12  ;;  %v238_v12 = vld [vmem:[#allocation2 + $0x110] sm:$0xff] }
  0x1f   :  { %190 = vmatpush.msra.mxu2 %v177_v37 }
  0x20   :  { %98 = vmatpush.msra.mxu0 %v77_v13  ;;  %v237_v13 = vld [vmem:[#allocation2 + $0x108] sm:$0xff] }
  0x21   :  { %191 = vmatpush.msra.mxu2 %v176_v38 }
  0x22   :  { %99 = vmatpush.msra.mxu0 %v76_v14  ;;  %v236_v14 = vld [vmem:[#allocation2 + $0x100] sm:$0xff] }
  0x23   :  { %192 = vmatpush.msra.mxu2 %v175_v39 }
  0x24   :  { %100 = vmatpush.msra.mxu0 %v75_v15  ;;  %v532_v15 = vld [vmem:[%s770_s5 + $0x1] ss:$0 sm:$0xff] }
  0x25   :  { %193 = vmatpush.msra.mxu2 %v174_v40  ;;  %v341_v40 = vld [vmem:[#allocation4 + $0x78] sm:$0xff] }
  0x26   :  { %101 = vmatpush.msra.mxu0 %v74_v16 }
  0x27   :  { %194 = vmatpush.msra.mxu2 %v173_v41  ;;  %v340_v41 = vld [vmem:[#allocation4 + $0x70] sm:$0xff] }
  0x28   :  { %102 = vmatpush.msra.mxu0 %v73_v17 }
  0x29   :  { %195 = vmatpush.msra.mxu2 %v172_v42  ;;  %v339_v42 = vld [vmem:[#allocation4 + $0x68] sm:$0xff] }
  0x2a   :  { %103 = vmatpush.msra.mxu0 %v72_v18 }
  0x2b   :  { %104 = vmatmul.f32.vlgmr.msra.gmra.mxu0 %v70_v19  ;;  %196 = vmatpush.msra.mxu2 %v171_v43  ;;  %v338_v43 = vld [vmem:[#allocation4 + $0x60] sm:$0xff] }
  0x2d   :  { %197 = vmatpush.msra.mxu2 %v170_v44  ;;  %v337_v44 = vld [vmem:[#allocation4 + $0x58] sm:$0xff] }
  0x2f   :  { %198 = vmatpush.msra.mxu2 %v169_v45  ;;  %v336_v45 = vld [vmem:[#allocation4 + $0x50] sm:$0xff] }
  0x31   :  { %199 = vmatpush.msra.mxu2 %v168_v46  ;;  %v335_v46 = vld [vmem:[#allocation4 + $0x48] sm:$0xff] }
  0x33   :  { %107 = vmatmul.f32.gmra.mxu0 %v71_v20 }
  0x80   :  { %v700_v29 = vpop.permute.xlu0 %113 }
  0x86   :  { %v713_v47 = vpop.permute.xlu1 %149 }
  0x88   :  { %v702_v31 = vpop.permute.xlu0 %118 }
  0x8e   :  { %v719_v52 = vpop.permute.xlu1 %154 }
  0xa8   :  { %v105_v30 = vpop.f32.mrf.mxu0 }
  0xa9   :  { %v121_v33 = vmul.f32 %v700_v29, %v105_v30  ;;  %v301_v30 = vlaneseq }
  0xb0   :  { %v108_v32 = vpop.f32.mrf.mxu0 }
  0xb1   :  { %v122_v34 = vmul.f32 %v702_v31, %v108_v32  ;;  %v735_v32 = vand.u32 127, %v301_v30  ;;  %v534_v30 = vld [vmem:[%s772_s7] ss:$0 sm:$0xff] }
  0xb3   :  { %v123_v35 = vpack.c.bf16 %v122_v34, %v121_v33  ;;  %v533_v33 = vld [vmem:[%s770_s5 + $0x2] ss:$0 sm:$0xff]  ;;  %vm303_vm1 = vcmp.lt.s32.totalorder %v735_v32, 8  ;;  %vm463_vm2 = vcmp.lt.s32.totalorder %v735_v32, 4 }
  0xb5   :  { %140 = vmatpush.bf16.msra.mxu1 %v123_v35 }
  0xb8   :  { %500 = vmatmul.msk.bf16.vlgmr.msra.gmra.mxu1 %vm129_vm0, %v709_v36 }
  0xb9   :  { %252 = vmatpush.msrb.mxu1 %v251_v58 }
  0xbb   :  { %253 = vmatpush.msrb.mxu1 %v250_v59  ;;  %v330_v59 = vld [vmem:[#allocation4 + $0x20] sm:$0xff] }
  0xbd   :  { %254 = vmatpush.msrb.mxu1 %v249_v60  ;;  %v329_v60 = vld [vmem:[#allocation4 + $0x18] sm:$0xff] }
  0xbf   :  { %255 = vmatpush.msrb.mxu1 %v248_v61  ;;  %v328_v61 = vld [vmem:[#allocation4 + $0x10] sm:$0xff] }
  0xc1   :  { %256 = vmatpush.msrb.mxu1 %v247_v62  ;;  %v327_v62 = vld [vmem:[#allocation4 + $0x8] sm:$0xff] }
  0xc3   :  { %257 = vmatpush.msrb.mxu1 %v246_v63  ;;  %v326_v63 = vld [vmem:[#allocation4] sm:$0xff] }
  0xc5   :  { %258 = vmatpush.msrb.mxu1 %v245_v0  ;;  %v387_v0 = vld [vmem:[#allocation4 + $0xf8] sm:$0xff] }
  0xc6   :  { %393 = vmatpush.msrb.mxu0 %v387_v0 }
  0xc7   :  { %259 = vmatpush.msrb.mxu1 %v244_v1  ;;  %v386_v1 = vld [vmem:[#allocation4 + $0xf0] sm:$0xff] }
  0xc8   :  { %394 = vmatpush.msrb.mxu0 %v386_v1 }
  0xc9   :  { %260 = vmatpush.msrb.mxu1 %v243_v2  ;;  %v385_v2 = vld [vmem:[#allocation4 + $0xe8] sm:$0xff] }
  0xca   :  { %395 = vmatpush.msrb.mxu0 %v385_v2 }
  0xcb   :  { %261 = vmatpush.msrb.mxu1 %v242_v4  ;;  %v383_v4 = vld [vmem:[#allocation4 + $0xd8] sm:$0xff] }
  0xcd   :  { %262 = vmatpush.msrb.mxu1 %v241_v9  ;;  %v379_v9 = vld [vmem:[#allocation4 + $0xb8] sm:$0xff] }
  0xcf   :  { %263 = vmatpush.msrb.mxu1 %v240_v10  ;;  %v378_v10 = vld [vmem:[#allocation4 + $0xb0] sm:$0xff] }
  0xd1   :  { %264 = vmatpush.msrb.mxu1 %v239_v11  ;;  %v377_v11 = vld [vmem:[#allocation4 + $0xa8] sm:$0xff] }
  0xd3   :  { %265 = vmatpush.msrb.mxu1 %v238_v12 }
  0xd5   :  { %266 = vmatpush.msrb.mxu1 %v237_v13 }
  0xd7   :  { %267 = vmatpush.msrb.mxu1 %v236_v14 }
  0xd9   :  { %508 = vmatpush.msra.mxu1 %v387_v0 }
  0xdb   :  { %509 = vmatpush.msra.mxu1 %v386_v1 }
  0xdd   :  { %510 = vmatpush.msra.mxu1 %v385_v2 }
 0x135   :  { %v142_v49 = vpop.f32.mrf.mxu1 }
 0x136   :  { %v157_v50 = vmul.f32 %v713_v47, %v142_v49 }
 0x138   :  { %v163_v51 = vadd.f32 %v531_v48, %v157_v50  ;;  %v333_v50 = vld [vmem:[#allocation4 + $0x38] sm:$0xff] }
 0x13a   :  { %537 = vtanh.f32 %v163_v51 }
 0x13d   :  { %v144_v53 = vpop.f32.mrf.mxu1 }
 0x13e   :  { %v158_v54 = vmul.f32 %v719_v52, %v144_v53  ;;  %v331_v53 = vld [vmem:[#allocation4 + $0x28] sm:$0xff] }
 0x140   :  { %v538_v55 = vpop.eup %537  ;;  %v164_v56 = vadd.f32 %v531_v48, %v158_v54  ;;  %v334_v48 = vld [vmem:[#allocation4 + $0x40] sm:$0xff] }
 0x141   :  { %200 = vmatmul.f32.vlgmr.msra.gmra.mxu2 %v538_v55 }
 0x142   :  { %539 = vtanh.f32 %v164_v56 }
 0x148   :  { %v540_v57 = vpop.eup %539 }
 0x149   :  { %203 = vmatmul.f32.gmra.mxu2 %v540_v57 }
 0x1c4   :  { %v201_v3 = vpop.f32.mrf.mxu2 }
 0x1c5   :  { %v207_v6 = vmul.f32 %v201_v3, %v700_v29  ;;  %v384_v3 = vld [vmem:[#allocation4 + $0xe0] sm:$0xff] }
 0x1c6   :  { %396 = vmatpush.msrb.mxu0 %v384_v3  ;;  %511 = vmatpush.msra.mxu1 %v384_v3 }
 0x1c8   :  { %397 = vmatpush.msrb.mxu0 %v383_v4  ;;  %512 = vmatpush.msra.mxu1 %v383_v4 }
 0x1cc   :  { %v204_v5 = vpop.f32.mrf.mxu2 }
 0x1cd   :  { %v208_v7 = vmul.f32 %v204_v5, %v702_v31  ;;  %v382_v5 = vld [vmem:[#allocation4 + $0xd0] sm:$0xff] }
 0x1ce   :  { %398 = vmatpush.msrb.mxu0 %v382_v5  ;;  %513 = vmatpush.msra.mxu1 %v382_v5 }
 0x1cf   :  { %v209_v8 = vpack.c.bf16 %v208_v7, %v207_v6  ;;  %v381_v6 = vld [vmem:[#allocation4 + $0xc8] sm:$0xff]  ;;  %v380_v7 = vld [vmem:[#allocation4 + $0xc0] sm:$0xff] }
 0x1d0   :  { %399 = vmatpush.msrb.mxu0 %v381_v6  ;;  %514 = vmatpush.msra.mxu1 %v381_v6 }
 0x1d1   :  { %217 = vmatpush.bf16.msra.mxu3 %v209_v8 }
 0x1d2   :  { %400 = vmatpush.msrb.mxu0 %v380_v7  ;;  %515 = vmatpush.msra.mxu1 %v380_v7 }
 0x1d4   :  { %501 = vmatmul.msk.bf16.vlgmr.msra.gmra.mxu3 %vm129_vm0, %v709_v36  ;;  %401 = vmatpush.msrb.mxu0 %v379_v9 }
 0x1d5   :  { %516 = vmatpush.msra.mxu1 %v379_v9 }
 0x1d6   :  { %402 = vmatpush.msrb.mxu0 %v378_v10 }
 0x1d7   :  { %517 = vmatpush.msra.mxu1 %v378_v10 }
 0x1d8   :  { %403 = vmatpush.msrb.mxu0 %v377_v11 }
 0x1d9   :  { %518 = vmatpush.msra.mxu1 %v377_v11 }
 0x257   :  { %v219_v16 = vpop.f32.mrf.mxu3 }
 0x258   :  { %v224_v17 = vmul.f32 %v219_v16, %v713_v47 }
 0x25a   :  { %v231_v18 = vadd.f32 %v532_v15, %v224_v17  ;;  %v376_v17 = vld [vmem:[#allocation4 + $0xa0] sm:$0xff] }
 0x25b   :  { %404 = vmatpush.msrb.mxu0 %v376_v17  ;;  %519 = vmatpush.msra.mxu1 %v376_v17 }
 0x25c   :  { %541 = vtanh.f32 %v231_v18  ;;  %v375_v18 = vld [vmem:[#allocation4 + $0x98] sm:$0xff] }
 0x25d   :  { %405 = vmatpush.msrb.mxu0 %v375_v18  ;;  %520 = vmatpush.msra.mxu1 %v375_v18 }
 0x25f   :  { %v221_v19 = vpop.f32.mrf.mxu3 }
 0x260   :  { %v225_v20 = vmul.f32 %v221_v19, %v719_v52  ;;  %v374_v19 = vld [vmem:[#allocation4 + $0x90] sm:$0xff] }
 0x261   :  { %406 = vmatpush.msrb.mxu0 %v374_v19  ;;  %521 = vmatpush.msra.mxu1 %v374_v19 }
 0x262   :  { %v542_v21 = vpop.eup %541  ;;  %v232_v22 = vadd.f32 %v532_v15, %v225_v20  ;;  %v373_v20 = vld [vmem:[#allocation4 + $0x88] sm:$0xff] }
 0x263   :  { %268 = vmatmul.f32.vlgmr.msrb.gmra.mxu1 %v542_v21  ;;  %407 = vmatpush.msrb.mxu0 %v373_v20  ;;  %v372_v21 = vld [vmem:[#allocation4 + $0x80] sm:$0xff] }
 0x264   :  { %543 = vtanh.f32 %v232_v22  ;;  %522 = vmatpush.msra.mxu1 %v373_v20  ;;  %v434_v22 = vld [vmem:[#allocation4 + $0x178] sm:$0xff] }
 0x265   :  { %408 = vmatpush.msrb.mxu0 %v372_v21  ;;  %440 = vmatpush.msrb.mxu2 %v434_v22 }
 0x266   :  { %523 = vmatpush.msra.mxu1 %v372_v21 }
 0x26a   :  { %v544_v23 = vpop.eup %543 }
 0x26b   :  { %271 = vmatmul.f32.gmra.mxu1 %v544_v23  ;;  %v433_v23 = vld [vmem:[#allocation4 + $0x170] sm:$0xff] }
 0x26c   :  { %441 = vmatpush.msrb.mxu2 %v433_v23 }
 0x2e0   :  { %v269_v24 = vpop.f32.mrf.mxu1 }
 0x2e1   :  { %v275_v26 = vmul.f32 %v269_v24, %v700_v29  ;;  %v432_v24 = vld [vmem:[#allocation4 + $0x168] sm:$0xff] }
 0x2e2   :  { %442 = vmatpush.msrb.mxu2 %v432_v24 }
 0x2e8   :  { %v272_v25 = vpop.f32.mrf.mxu1 }
 0x2e9   :  { %v276_v27 = vmul.f32 %v272_v25, %v702_v31  ;;  %v431_v25 = vld [vmem:[#allocation4 + $0x160] sm:$0xff] }
 0x2ea   :  { %443 = vmatpush.msrb.mxu2 %v431_v25 }
 0x2eb   :  { %v277_v28 = vpack.c.bf16 %v276_v27, %v275_v26  ;;  %v430_v26 = vld [vmem:[#allocation4 + $0x158] sm:$0xff]  ;;  %v429_v27 = vld [vmem:[#allocation4 + $0x150] sm:$0xff] }
 0x2ec   :  { %444 = vmatpush.msrb.mxu2 %v430_v26 }
 0x2ed   :  { %285 = vmatpush.bf16.msrb.mxu3 %v277_v28  ;;  %v428_v28 = vld [vmem:[#allocation4 + $0x148] sm:$0xff] }
 0x2ee   :  { %445 = vmatpush.msrb.mxu2 %v429_v27 }
 0x2f0   :  { %503 = vmatmul.msk.bf16.vlgmr.msrb.gmra.mxu3 %vm129_vm0, %v709_v36  ;;  %446 = vmatpush.msrb.mxu2 %v428_v28 }
 0x2f1   :  { %346 = vmatpush.msra.mxu3 %v341_v40 }
 0x2f3   :  { %347 = vmatpush.msra.mxu3 %v340_v41  ;;  %v423_v41 = vld [vmem:[#allocation4 + $0x120] sm:$0xff] }
 0x2f5   :  { %348 = vmatpush.msra.mxu3 %v339_v42  ;;  %v422_v42 = vld [vmem:[#allocation4 + $0x118] sm:$0xff] }
 0x2f7   :  { %349 = vmatpush.msra.mxu3 %v338_v43  ;;  %v421_v43 = vld [vmem:[#allocation4 + $0x110] sm:$0xff] }
 0x2f9   :  { %350 = vmatpush.msra.mxu3 %v337_v44  ;;  %v420_v44 = vld [vmem:[#allocation4 + $0x108] sm:$0xff] }
 0x2fb   :  { %351 = vmatpush.msra.mxu3 %v336_v45  ;;  %v419_v45 = vld [vmem:[#allocation4 + $0x100] sm:$0xff] }
 0x2fd   :  { %352 = vmatpush.msra.mxu3 %v335_v46  ;;  %v535_v46 = vld [vmem:[%s772_s7 + $0x1] ss:$0 sm:$0xff] }
 0x2ff   :  { %353 = vmatpush.msra.mxu3 %v334_v48 }
 0x301   :  { %354 = vmatpush.msra.mxu3 %v333_v50 }
 0x373   :  { %v287_v34 = vpop.f32.mrf.mxu3 }
 0x374   :  { %v292_v35 = vmul.f32 %v287_v34, %v713_v47 }
 0x376   :  { %v299_v29 = vadd.f32 %v533_v33, %v292_v35  ;;  %v426_v35 = vld [vmem:[#allocation4 + $0x138] sm:$0xff] }
 0x378   :  { %v304_v37 = vsel %vm303_vm1, %v299_v29, -1e+30 }
 0x379   :  { %306 = vmax.xlane.f32.xlu2 %v304_v37 }
 0x37b   :  { %v289_v31 = vpop.f32.mrf.mxu3 }
 0x37c   :  { %v293_v38 = vmul.f32 %v289_v31, %v719_v52  ;;  %v332_v52 = vld [vmem:[#allocation4 + $0x30] sm:$0xff]  ;;  %v424_v31 = vld [vmem:[#allocation4 + $0x128] sm:$0xff] }
 0x37d   :  { %355 = vmatpush.msra.mxu3 %v332_v52 }
 0x37e   :  { %v300_v39 = vadd.f32 %v533_v33, %v293_v38  ;;  %v427_v33 = vld [vmem:[#allocation4 + $0x140] sm:$0xff] }
 0x37f   :  { %356 = vmatpush.msra.mxu3 %v331_v53  ;;  %447 = vmatpush.msrb.mxu2 %v427_v33  ;;  %v536_v53 = vld [vmem:[%s772_s7 + $0x2] ss:$0 sm:$0xff] }
 0x380   :  { %v305_v36 = vsel %vm303_vm1, %v300_v39, -1e+30 }
 0x381   :  { %308 = vmax.xlane.f32.xlu2 %v305_v36  ;;  %357 = vmatpush.msra.mxu3 %v330_v59 }
 0x382   :  { %448 = vmatpush.msrb.mxu2 %v426_v35 }
 0x383   :  { %358 = vmatpush.msra.mxu3 %v329_v60 }
 0x385   :  { %359 = vmatpush.msra.mxu3 %v328_v61 }
 0x387   :  { %360 = vmatpush.msra.mxu3 %v327_v62 }
 0x389   :  { %361 = vmatpush.msra.mxu3 %v326_v63 }
 0x3ec   :  { %v307_v47 = vpop.xlane.xlu2 %306 }
 0x3ed   :  { %v310_v49 = vsub.f32 %v304_v37, %v307_v47  ;;  %v425_v37 = vld [vmem:[#allocation4 + $0x130] sm:$0xff] }
 0x3ee   :  { %449 = vmatpush.msrb.mxu2 %v425_v37 }
 0x3ef   :  { %v312_v51 = vmul.f32 1.442695, %v310_v49 }
 0x3f0   :  { %450 = vmatpush.msrb.mxu2 %v424_v31 }
 0x3f1   :  { %545 = vpow2.f32 %v312_v51 }
 0x3f2   :  { %451 = vmatpush.msrb.mxu2 %v423_v41 }
 0x3f4   :  { %v309_v54 = vpop.xlane.xlu2 %308  ;;  %452 = vmatpush.msrb.mxu2 %v422_v42 }
 0x3f5   :  { %v311_v55 = vsub.f32 %v305_v36, %v309_v54 }
 0x3f6   :  { %453 = vmatpush.msrb.mxu2 %v421_v43 }
 0x3f7   :  { %v546_v56 = vpop.eup %545  ;;  %v314_v57 = vmul.f32 1.442695, %v311_v55 }
 0x3f8   :  { %316 = vadd.xlane.f32.xlu0 %v546_v56  ;;  %454 = vmatpush.msrb.mxu2 %v420_v44 }
 0x3f9   :  { %547 = vpow2.f32 %v314_v57 }
 0x3fa   :  { %455 = vmatpush.msrb.mxu2 %v419_v45 }
 0x3ff   :  { %v548_v58 = vpop.eup %547 }
 0x400   :  { %318 = vadd.xlane.f32.xlu1 %v548_v58 }
 0x46b   :  { %v317_v8 = vpop.xlane.xlu0 %316 }
 0x46c   :  { %549 = vrcp.f32 %v317_v8 }
 0x472   :  { %v550_v12 = vpop.eup %549 }
 0x473   :  { %v322_v13 = vmul.f32 %v550_v12, %v546_v56  ;;  %v319_v14 = vpop.xlane.xlu1 %318 }
 0x474   :  { %551 = vrcp.f32 %v319_v14 }
 0x475   :  { %324 = vst [vmem:[%s773_s8] sm:$0xff] %v322_v13  ;;  %362 = vmatmul.f32.vlgmr.msra.gmra.mxu3 %v322_v13 }
 0x47a   :  { %v552_v15 = vpop.eup %551 }
 0x47b   :  { %v323_v16 = vmul.f32 %v552_v15, %v548_v58 }
 0x47d   :  { %325 = vst [vmem:[%s773_s8 + $0x8] sm:$0xff] %v323_v16  ;;  %365 = vmatmul.f32.gmra.mxu3 %v323_v16 }
 0x4f8   :  { %v363_v34 = vpop.f32.mrf.mxu3 }
 0x4f9   :  { %v364_v29 = vadd.f32 %v534_v30, %v363_v34 }
 0x4fb   :  { %553 = vtanh.f32 %v364_v29 }
 0x500   :  { %v366_v38 = vpop.f32.mrf.mxu3 }
 0x501   :  { %v554_v39 = vpop.eup %553  ;;  %v367_v36 = vadd.f32 %v534_v30, %v366_v38 }
 0x502   :  { %409 = vmatmul.f32.vlgmr.msrb.gmra.mxu0 %v554_v39 }
 0x503   :  { %555 = vtanh.f32 %v367_v36 }
 0x509   :  { %v556_v40 = vpop.eup %555 }
 0x50a   :  { %412 = vmatmul.f32.vlgmr.msra.gmra.mxu1 %v556_v40 }
 0x57f   :  { %v410_v47 = vpop.f32.mrf.mxu0 }
 0x580   :  { %v411_v48 = vadd.f32 %v535_v46, %v410_v47 }
 0x582   :  { %557 = vtanh.f32 %v411_v48 }
 0x587   :  { %v413_v49 = vpop.f32.mrf.mxu1 }
 0x588   :  { %v558_v50 = vpop.eup %557  ;;  %v414_v51 = vadd.f32 %v535_v46, %v413_v49 }
 0x589   :  { %456 = vmatmul.f32.vlgmr.msrb.gmra.mxu2 %v558_v50 }
 0x58a   :  { %559 = vtanh.f32 %v414_v51 }
 0x590   :  { %v560_v52 = vpop.eup %559 }
 0x591   :  { %459 = vmatmul.f32.gmra.mxu2 %v560_v52 }
 0x60c   :  { %v457_v54 = vpop.f32.mrf.mxu2 }
 0x60d   :  { %v458_v55 = vadd.f32 %v536_v53, %v457_v54 }
 0x60f   :  { %v464_v56 = vsel %vm463_vm2, %v458_v55, -1e+30 }
 0x610   :  { %466 = vmax.xlane.f32.xlu2 %v464_v56 }
 0x614   :  { %v460_v57 = vpop.f32.mrf.mxu2 }
 0x615   :  { %v461_v58 = vadd.f32 %v536_v53, %v460_v57 }
 0x617   :  { %v465_v59 = vsel %vm463_vm2, %v461_v58, -1e+30 }
 0x618   :  { %468 = vmax.xlane.f32.xlu2 %v465_v59 }
 0x683   :  { %v467_v60 = vpop.xlane.xlu2 %466 }
 0x684   :  { %v470_v61 = vsub.f32 %v464_v56, %v467_v60 }
 0x686   :  { %v472_v62 = vmul.f32 1.442695, %v470_v61 }
 0x688   :  { %561 = vpow2.f32 %v472_v62 }
 0x68b   :  { %v469_v63 = vpop.xlane.xlu2 %468 }
 0x68c   :  { %v471_v0 = vsub.f32 %v465_v59, %v469_v63 }
 0x68e   :  { %v562_v1 = vpop.eup %561  ;;  %v474_v2 = vmul.f32 1.442695, %v471_v0 }
 0x68f   :  { %476 = vadd.xlane.f32.xlu2 %v562_v1 }
 0x690   :  { %563 = vpow2.f32 %v474_v2 }
 0x696   :  { %v564_v3 = vpop.eup %563 }
 0x697   :  { %478 = vadd.xlane.f32.xlu2 %v564_v3 }
 0x702   :  { %v477_v32 = vpop.xlane.xlu2 %476 }
 0x703   :  { %565 = vrcp.f32 %v477_v32 }
 0x709   :  { %v566_v4 = vpop.eup %565 }
 0x70a   :  { %v482_v5 = vmul.f32 %v566_v4, %v562_v1  ;;  %v479_v6 = vpop.xlane.xlu2 %478 }
 0x70b   :  { %567 = vrcp.f32 %v479_v6 }
 0x70c   :  { %484 = vst [vmem:[%s774_s9] sm:$0xff] %v482_v5 }
 0x711   :  { %v568_v7 = vpop.eup %567 }
 0x712   :  { %v483_v8 = vmul.f32 %v568_v7, %v564_v3 }
 0x714   :  { %485 = vst [vmem:[%s774_s9 + $0x8] sm:$0xff] %v483_v8 }
 0x715   :  { %494 = vsyncpa [#allocation3], 1 }
 0x716   :  { %495 = vsyncpa [#allocation5], 1 }

</bundles_post_ra>
